<compile_context>
chip_gen: v6e
topology: v6e:2x2x1
jax: 0.10.0
libtpu: 0.0.40
codegen_flags: <defaults>
</compile_context>

<pallas_src>
import functools
import math

import jax
import jax.numpy as jnp
from jax.experimental import pallas as pl
from jax.experimental.pallas import tpu as pltpu


# ---------------------------------------------------------------------------
# Helpers
# ---------------------------------------------------------------------------
def _pick_tile(dim, target, unit):
    """Largest multiple of `unit` <= target that divides `dim` (else full dim)."""
    if dim <= target:
        return dim
    t = (target // unit) * unit
    while t >= unit:
        if dim % t == 0:
            return t
        t -= unit
    return dim


def _head_group_width(dk, d_model):
    """Lane width of one head group: smallest multiple of dk divisible by 128
    (so every group slab is 128-lane aligned), falling back to the full
    d_model when that is not possible (e.g. d_model < 128)."""
    g = (dk * 128) // math.gcd(dk, 128)  # lcm(dk, 128)
    if g > d_model or d_model % g != 0:
        g = d_model
    return g


# ---------------------------------------------------------------------------
# Tiled linear (x @ W + b) kernels
# ---------------------------------------------------------------------------
def _linear_bias_kernel(x_ref, w_ref, b_ref, o_ref):
    # Single K step: no scratch accumulator, bias added directly.
    o_ref[...] = (
        jnp.dot(
            x_ref[...].astype(jnp.bfloat16),
            w_ref[...].astype(jnp.bfloat16),
            preferred_element_type=jnp.float32,
        )
        + b_ref[...]
    ).astype(o_ref.dtype)


def _linear_acc_kernel(x_ref, w_ref, b_ref, o_ref, acc_ref):
    k = pl.program_id(2)

    @pl.when(k == 0)
    def _init():
        # Fold the bias into the accumulator init (no separate finalize add).
        acc_ref[...] = jnp.broadcast_to(b_ref[...], acc_ref.shape)

    acc_ref[...] += jnp.dot(
        x_ref[...].astype(jnp.bfloat16),
        w_ref[...].astype(jnp.bfloat16),
        preferred_element_type=jnp.float32,
    )

    @pl.when(k == pl.num_programs(2) - 1)
    def _finalize():
        o_ref[...] = acc_ref[...].astype(o_ref.dtype)


def pallas_linear(x2d, w, b, *, out_dtype=None,
                  tm_target=512, tn_target=256, tk_target=512):
    """x2d: (N, d_in), w: (d_in, d_out), b: (d_out,) -> (N, d_out)."""
    N, d_in = x2d.shape
    d_out = w.shape[1]
    if out_dtype is None:
        out_dtype = x2d.dtype
    tm = _pick_tile(N, tm_target, 8)
    tn = _pick_tile(d_out, tn_target, 128)
    tk = _pick_tile(d_in, tk_target, 128)
    nm, nn, nk = N // tm, d_out // tn, d_in // tk
    b2d = b.reshape(1, d_out).astype(jnp.float32)

    x_bytes = jnp.dtype(x2d.dtype).itemsize
    w_bytes = jnp.dtype(w.dtype).itemsize
    o_bytes = jnp.dtype(out_dtype).itemsize
    cost = pl.CostEstimate(
        flops=2 * N * d_in * d_out,
        transcendentals=0,
        bytes_accessed=int(
            nn * N * d_in * x_bytes        # x re-streamed per output-col block
            + nm * d_in * d_out * w_bytes  # w re-streamed per output-row block
            + N * d_out * o_bytes
        ),
    )

    if nk == 1:
        return pl.pallas_call(
            _linear_bias_kernel,
            out_shape=jax.ShapeDtypeStruct((N, d_out), out_dtype),
            grid_spec=pltpu.PrefetchScalarGridSpec(
                num_scalar_prefetch=0,
                grid=(nm, nn),
                in_specs=[
                    pl.BlockSpec((tm, tk), lambda i, j: (i, 0)),
                    pl.BlockSpec((tk, tn), lambda i, j: (0, j)),
                    pl.BlockSpec((1, tn), lambda i, j: (0, j)),
                ],
                out_specs=pl.BlockSpec((tm, tn), lambda i, j: (i, j)),
            ),
            compiler_params=pltpu.CompilerParams(
                dimension_semantics=("parallel", "parallel")
            ),
            cost_estimate=cost,
        )(x2d, w, b2d)

    return pl.pallas_call(
        _linear_acc_kernel,
        out_shape=jax.ShapeDtypeStruct((N, d_out), out_dtype),
        grid_spec=pltpu.PrefetchScalarGridSpec(
            num_scalar_prefetch=0,
            grid=(nm, nn, nk),
            in_specs=[
                pl.BlockSpec((tm, tk), lambda i, j, k: (i, k)),
                pl.BlockSpec((tk, tn), lambda i, j, k: (k, j)),
                pl.BlockSpec((1, tn), lambda i, j, k: (0, j)),
            ],
            out_specs=pl.BlockSpec((tm, tn), lambda i, j, k: (i, j)),
            scratch_shapes=[pltpu.VMEM((tm, tn), jnp.float32)],
        ),
        compiler_params=pltpu.CompilerParams(
            dimension_semantics=("parallel", "parallel", "arbitrary")
        ),
        cost_estimate=cost,
    )(x2d, w, b2d)


# ---------------------------------------------------------------------------
# Flash multi-head attention kernel (online softmax over KV tiles)
# ---------------------------------------------------------------------------
def _flash_mha_kernel(q_ref, k_ref, v_ref, o_ref, m_ref, l_ref, acc_ref,
                      *, hpg, dk):
    """Grid = (B, head_group, Sq/tq, Sk/tk).  Block lane width = hpg*dk
    (128-aligned or full d_model).  hpg = heads per group (small, e.g. 1-2)."""
    ki = pl.program_id(3)

    @pl.when(ki == 0)
    def _init():
        m_ref[...] = jnp.full(m_ref.shape, -jnp.inf, m_ref.dtype)
        l_ref[...] = jnp.zeros(l_ref.shape, l_ref.dtype)
        acc_ref[...] = jnp.zeros(acc_ref.shape, acc_ref.dtype)

    # Inputs already carry the softmax scale (folded into wq/bq).
    q = q_ref[0]                     # (tq, hpg*dk)
    k = k_ref[0]                     # (tk, hpg*dk)
    v = v_ref[0]                     # (tk, hpg*dk)

    for hh in range(hpg):            # small static unroll (heads in this group)
        lo = hh * dk
        q_h = q[:, lo:lo + dk].astype(jnp.bfloat16)     # (tq, dk)
        k_h = k[:, lo:lo + dk].astype(jnp.bfloat16)     # (tk, dk)
        v_h = v[:, lo:lo + dk].astype(jnp.bfloat16)     # (tk, dk)

        # QK^T: contract last dims -> no materialized transpose of K; bf16 MXU,
        # f32 accumulation.
        s = jax.lax.dot_general(
            q_h, k_h, (((1,), (1,)), ((), ())),
            preferred_element_type=jnp.float32,
        )                                               # (tq, tk) f32

        m_prev = m_ref[hh]                              # (tq, 1) f32
        m_new = jnp.maximum(m_prev, jnp.max(s, axis=-1, keepdims=True))
        alpha = jnp.exp(m_prev - m_new)                 # (tq, 1) f32
        p = jnp.exp(s - m_new)                          # (tq, tk) f32

        l_ref[hh] = alpha * l_ref[hh] + jnp.sum(p, axis=-1, keepdims=True)
        # Per-head accumulator slab starts at lane 0 (aligned scratch).
        acc_ref[hh] = alpha * acc_ref[hh] + jnp.dot(
            p.astype(jnp.bfloat16), v_h, preferred_element_type=jnp.float32
        )
        m_ref[hh] = m_new

    @pl.when(ki == pl.num_programs(3) - 1)
    def _finalize():
        # Deferred normalization (EUP approx reciprocal); write each head's
        # slab straight into the lane-dense output block (no concatenate).
        if hpg == 1:
            o_ref[0] = (
                acc_ref[0] * pl.reciprocal(l_ref[0], approx=True)
            ).astype(o_ref.dtype)
        else:
            for hh in range(hpg):
                o_ref[0, :, hh * dk:(hh + 1) * dk] = (
                    acc_ref[hh] * pl.reciprocal(l_ref[hh], approx=True)
                ).astype(o_ref.dtype)


def pallas_attention(q, k, v, n_head, *, tq_target=256, tk_target=256):
    """q: (B, Sq, D), k/v: (B, Sk, D) -> (B, Sq, D) (head-major columns).
    Scale 1/sqrt(dk) is assumed to be already folded into q."""
    B, Sq, D = q.shape
    Sk = k.shape[1]
    dk = D // n_head
    gw = _head_group_width(dk, D)       # 128-aligned group width (or full D)
    hpg = gw // dk                      # heads per group
    n_groups = D // gw
    tq = _pick_tile(Sq, tq_target, 8)
    tk = _pick_tile(Sk, tk_target, 8)
    grid = (B, n_groups, Sq // tq, Sk // tk)

    kernel = functools.partial(_flash_mha_kernel, hpg=hpg, dk=dk)

    q_spec = pl.BlockSpec((1, tq, gw), lambda b, g, qi, ki: (b, qi, g))
    kv_spec = pl.BlockSpec((1, tk, gw), lambda b, g, qi, ki: (b, ki, g))
    out_spec = pl.BlockSpec((1, tq, gw), lambda b, g, qi, ki: (b, qi, g))

    itemsize = jnp.dtype(q.dtype).itemsize
    n_kv_restream = Sq // tq
    dk_pad = ((dk + 127) // 128) * 128
    # Rough per-call VMEM budget: double-buffered q/k/v/out tiles + scratch.
    vmem_budget = (
        2 * (tq * gw + 2 * tk * gw + tq * gw) * itemsize
        + hpg * tq * (dk_pad + 2 * 128) * 4
    )
    cp_kwargs = dict(
        dimension_semantics=("parallel", "parallel", "parallel", "arbitrary")
    )
    if vmem_budget > 32 * 1024 * 1024:
        cp_kwargs["vmem_limit_bytes"] = min(
            int(1.5 * vmem_budget), 64 * 1024 * 1024
        )

    return pl.pallas_call(
        kernel,
        out_shape=jax.ShapeDtypeStruct((B, Sq, D), q.dtype),
        grid_spec=pltpu.PrefetchScalarGridSpec(
            num_scalar_prefetch=0,
            grid=grid,
            in_specs=[q_spec, kv_spec, kv_spec],
            out_specs=out_spec,
            scratch_shapes=[
                pltpu.VMEM((hpg, tq, 1), jnp.float32),    # running max
                pltpu.VMEM((hpg, tq, 1), jnp.float32),    # running sum
                pltpu.VMEM((hpg, tq, dk), jnp.float32),   # per-head output acc
            ],
        ),
        compiler_params=pltpu.CompilerParams(**cp_kwargs),
        cost_estimate=pl.CostEstimate(
            flops=4 * B * n_head * Sq * Sk * dk,
            transcendentals=B * n_head * Sq * Sk,
            bytes_accessed=int(
                itemsize * (2 * B * Sq * D                    # q in, out
                            + 2 * n_kv_restream * B * Sk * D)  # k/v re-streamed
            ),
        ),
    )(q, k, v)


# ---------------------------------------------------------------------------
# Module wrapper
# ---------------------------------------------------------------------------
class MultiHeadedAttentionPallas:
    def __init__(self, d_model, n_head, key, attn_block_q=256, attn_block_kv=256):
        assert d_model % n_head == 0
        self.d_model = d_model
        self.n_head = n_head
        self.d_key = d_model // n_head
        self.attn_block_q = attn_block_q
        self.attn_block_kv = attn_block_kv

        # Deterministic nn.Linear-style init: U(-1/sqrt(fan_in), 1/sqrt(fan_in)).
        bound = 1.0 / math.sqrt(d_model)
        keys = jax.random.split(key, 8)

        def init_linear(kw, kb):
            # stored pre-transposed: (d_in, d_out)
            w = jax.random.uniform(
                kw, (d_model, d_model), jnp.float32, -bound, bound
            )
            b = jax.random.uniform(kb, (d_model,), jnp.float32, -bound, bound)
            return w, b

        wq, bq = init_linear(keys[0], keys[1])
        wk, bk = init_linear(keys[2], keys[3])
        wv, bv = init_linear(keys[4], keys[5])
        wo, bo = init_linear(keys[6], keys[7])

        # Fold the 1/sqrt(d_key) attention scale into the Q projection (zero
        # runtime cost) and store matmul weights in bf16 (native MXU rate,
        # half the HBM/VMEM traffic).  Biases stay f32 (added in f32).
        sm_scale = 1.0 / math.sqrt(self.d_key)
        self.wq = (wq * sm_scale).astype(jnp.bfloat16)
        self.bq = bq * sm_scale
        self.wk = wk.astype(jnp.bfloat16)
        self.bk = bk
        self.wv = wv.astype(jnp.bfloat16)
        self.bv = bv
        self.wo = wo.astype(jnp.bfloat16)
        self.bo = bo

    def __call__(self, query, key, value, mask=None):
        assert mask is None  # TODO(synk): mask path not implemented
        B, Sq, D = query.shape
        Sk = key.shape[1]

        # Projections (tiled bf16 matmuls); intermediates kept in bf16.
        q = pallas_linear(query.reshape(B * Sq, D), self.wq, self.bq,
                          out_dtype=jnp.bfloat16)
        k = pallas_linear(key.reshape(B * Sk, D), self.wk, self.bk,
                          out_dtype=jnp.bfloat16)
        v = pallas_linear(value.reshape(B * Sk, D), self.wv, self.bv,
                          out_dtype=jnp.bfloat16)
        q = q.reshape(B, Sq, D)
        k = k.reshape(B, Sk, D)
        v = v.reshape(B, Sk, D)

        # Flash attention; output already in (B, Sq, H*dk) layout.
        out = pallas_attention(
            q, k, v, self.n_head,
            tq_target=self.attn_block_q, tk_target=self.attn_block_kv,
        )

        out = pallas_linear(out.reshape(B * Sq, D), self.wo, self.bo,
                            out_dtype=query.dtype)
        return out.reshape(B, Sq, D)


# ---------------------------------------------------------------------------
# Pure-JAX reference (mirrors the bf16 matmul path; for sanity check)
# ---------------------------------------------------------------------------
def reference_forward(mha, query, key, value):
    B, Sq, D = query.shape
    Sk = key.shape[1]
    H, dk = mha.n_head, mha.d_key

    def lin(x, w, b, out_dtype):
        y = jnp.dot(x.astype(jnp.bfloat16), w.astype(jnp.bfloat16),
                    preferred_element_type=jnp.float32) + b
        return y.astype(out_dtype)

    q = lin(query.reshape(-1, D), mha.wq, mha.bq, jnp.bfloat16)
    k = lin(key.reshape(-1, D), mha.wk, mha.bk, jnp.bfloat16)
    v = lin(value.reshape(-1, D), mha.wv, mha.bv, jnp.bfloat16)
    q = q.reshape(B, Sq, H, dk).transpose(0, 2, 1, 3).astype(jnp.float32)
    k = k.reshape(B, Sk, H, dk).transpose(0, 2, 1, 3).astype(jnp.float32)
    v = v.reshape(B, Sk, H, dk).transpose(0, 2, 1, 3).astype(jnp.float32)
    # NOTE: 1/sqrt(dk) already folded into wq/bq, so no extra scaling here.
    scores = jnp.einsum("bhqd,bhkd->bhqk", q, k)
    p = jax.nn.softmax(scores, axis=-1)
    p = p.astype(jnp.bfloat16).astype(jnp.float32)   # mirror kernel bf16 PV
    out = jnp.einsum("bhqk,bhkd->bhqd", p, v)
    out = out.transpose(0, 2, 1, 3).reshape(B * Sq, H * dk).astype(jnp.bfloat16)
    out = lin(out, mha.wo, mha.bo, jnp.float32)
    return out.reshape(B, Sq, D)


if __name__ == "__main__":
    d_model = 64
    n_head = 4
    batch = 2
    seq = 16

    key0 = jax.random.PRNGKey(0)
    k_q, k_k, k_v, k_params = jax.random.split(key0, 4)

    query = jax.random.normal(k_q, (batch, seq, d_model), jnp.float32)
    key_in = jax.random.normal(k_k, (batch, seq, d_model), jnp.float32)
    value = jax.random.normal(k_v, (batch, seq, d_model), jnp.float32)

    # Small attention tiles so the flash KV loop actually runs multiple steps.
    mha = MultiHeadedAttentionPallas(
        d_model, n_head, k_params, attn_block_q=8, attn_block_kv=8
    )

    out = jax.block_until_ready(mha(query, key_in, value))
    ref = reference_forward(mha, query, key_in, value)
    assert out.shape == (batch, seq, d_model)
    assert jnp.allclose(out, ref, atol=2e-2, rtol=2e-2), float(
        jnp.max(jnp.abs(out - ref))
    )

    # Extra check: exercise the tiled K-accumulation path of pallas_linear.
    kx, kw, kb = jax.random.split(jax.random.PRNGKey(1), 3)
    xl = jax.random.normal(kx, (64, 256), jnp.float32)
    wl = jax.random.normal(kw, (256, 128), jnp.float32) * 0.1
    bl = jax.random.normal(kb, (128,), jnp.float32)
    yl = jax.block_until_ready(
        pallas_linear(xl, wl, bl, out_dtype=jnp.float32,
                      tm_target=16, tn_target=128, tk_target=128)
    )
    ref_l = jnp.dot(xl.astype(jnp.bfloat16), wl.astype(jnp.bfloat16),
                    preferred_element_type=jnp.float32) + bl
    assert jnp.allclose(yl, ref_l, atol=3e-2, rtol=3e-2), float(
        jnp.max(jnp.abs(yl - ref_l))
    )

    print("KERNEL_OK")
</pallas_src>

<mosaic_0001>
module attributes {stable_mosaic.version = 11 : i64} {
  func.func @_linear_bias_kernel(%arg0: i32, %arg1: i32, %arg2: memref<32x64xf32, #tpu.memory_space<vmem>>, %arg3: memref<64x64xbf16, #tpu.memory_space<vmem>>, %arg4: memref<1x64xf32, #tpu.memory_space<vmem>>, %arg5: memref<32x64xbf16, #tpu.memory_space<vmem>>) attributes {dimension_semantics = [#tpu.dimension_semantics<parallel>, #tpu.dimension_semantics<parallel>], iteration_bounds = array<i64: 1, 1>, scalar_prefetch = 0 : i64, scratch_operands = 0 : i64, tpu.core_type = #tpu.core_type<tc>, window_params = [{transform_indices = @transform_0, window_bounds = array<i64: 32, 64>}, {transform_indices = @transform_1, window_bounds = array<i64: 64, 64>}, {transform_indices = @transform_2, window_bounds = array<i64: 1, 64>}, {transform_indices = @transform_3, window_bounds = array<i64: 32, 64>}]} {
    %c0 = arith.constant 0 : index
    %c0_0 = arith.constant 0 : index
    %0 = vector.load %arg2[%c0, %c0_0] : memref<32x64xf32, #tpu.memory_space<vmem>>, vector<32x64xf32>
    %1 = arith.truncf %0 : vector<32x64xf32> to vector<32x64xbf16>
    %c0_1 = arith.constant 0 : index
    %c0_2 = arith.constant 0 : index
    %2 = vector.load %arg3[%c0_1, %c0_2] : memref<64x64xbf16, #tpu.memory_space<vmem>>, vector<64x64xbf16>
    %cst = arith.constant dense<0.000000e+00> : vector<32x64xf32>
    %3 = tpu.matmul %1, %2, %cst {dimension_numbers = #tpu.dot_dimension_numbers<[1], [0], [0], [1], [0, 0, 1, 1], [], []>} : vector<32x64xbf16>, vector<64x64xbf16>, vector<32x64xf32> -> vector<32x64xf32>
    %c0_3 = arith.constant 0 : index
    %c0_4 = arith.constant 0 : index
    %4 = vector.load %arg4[%c0_3, %c0_4] : memref<1x64xf32, #tpu.memory_space<vmem>>, vector<1x64xf32>
    %5 = vector.broadcast %4 : vector<1x64xf32> to vector<32x64xf32>
    %6 = arith.addf %3, %5 : vector<32x64xf32>
    %7 = arith.truncf %6 : vector<32x64xf32> to vector<32x64xbf16>
    %c0_5 = arith.constant 0 : index
    %c0_6 = arith.constant 0 : index
    %8 = vector.load %arg5[%c0_5, %c0_6] : memref<32x64xbf16, #tpu.memory_space<vmem>>, vector<32x64xbf16>
    tpu.vector_store %arg5[%c0_5, %c0_6], %7 {strides = array<i32>} : memref<32x64xbf16, #tpu.memory_space<vmem>>, vector<32x64xbf16>,
    return
  }
  func.func @transform_0(%arg0: i32, %arg1: i32) -> (i32, i32) {
    %c0_i32 = arith.constant 0 : i32
    %c0_i32_0 = arith.constant 0 : i32
    return %arg0, %c0_i32 : i32, i32
  }
  func.func @transform_1(%arg0: i32, %arg1: i32) -> (i32, i32) {
    %c0_i32 = arith.constant 0 : i32
    %c0_i32_0 = arith.constant 0 : i32
    return %c0_i32, %arg1 : i32, i32
  }
  func.func @transform_2(%arg0: i32, %arg1: i32) -> (i32, i32) {
    %c0_i32 = arith.constant 0 : i32
    %c0_i32_0 = arith.constant 0 : i32
    return %c0_i32, %arg1 : i32, i32
  }
  func.func @transform_3(%arg0: i32, %arg1: i32) -> (i32, i32) {
    %c0_i32 = arith.constant 0 : i32
    return %arg0, %arg1 : i32, i32
  }
}

</mosaic_0001>

<bundles_post_ra>
// kernel: tpu_custom_call.1
= control target key start
LH: loop header
LB: loop body
LE: loop exit
PB: predicated region body
PF: predicated region fallthrough
CT: control target
= control target key end

     0   :  { %8 = vsyncpa [#allocation3], 0  ;;  %s343_s0 = inlined_call_operand.hbm [shape: f32[32,64], index: 0, kind: input, shape index: {}]   ;;  %s344_s1 = inlined_call_operand.hbm [shape: bf16[64,64], index: 1, kind: input, shape index: {}]   ;;  %s345_s2 = inlined_call_operand.vmem [shape: f32[1,64], index: 2, kind: input, shape index: {}]   ;;  %s346_s3 = inlined_call_operand.hbm [shape: bf16[32,64], index: 3, kind: output, shape index: {}]  }
   0x1   :  { %9 = vsyncpa [#allocation6], 0 }
   0x2   :  { %10 = vsyncpa [#allocation4], 0  ;;  %s294_s12 = smov [#allocation2]  }
   0x3   :  { %s16_s13 = sshll.u32 %s294_s12, 4  ;;  %s17_s13 = int_to_ptr.vmem [resolvable:$true] %s16_s13 }
   0x4   :  { %s236_s14 = scalar_lea.vmem %s17_s13, 512  ;;  %p241_p1 = scmp.lt.s32.totalorder %s17_s13, %s17_s13 }
   0x5   :  { %p237_p0 = scmp.ne.s32.totalorder %s17_s13, %s236_s14  ;;  %p242_p2 = scmp.lt.s32.totalorder %s236_s14, %s236_s14 }
   0x7   :  { %p243_p3 = por %p242_p2, %p241_p1 }
   0x9   :  { %p244_p4 = pnand %p243_p3, %p237_p0 }
   0xb   :  { %247 = shalt.err (!%p244_p4)
}
   0xc   :  { %s295_s15 = smov 128   ;;  %s296_s16 = smov 8  }
   0xd   :  { %22 = dma.hbm_to_vmem [thread:$0]  %s343_s0, 512, %s17_s13, [#allocation3], %s295_s15, %s295_s15, %s296_s16  }
   0xe   :  { %s297_s19 = smov [#allocation5]  }
   0xf   :  { %s28_s20 = sshll.u32 %s297_s19, 4  ;;  %s29_s20 = int_to_ptr.vmem [resolvable:$true] %s28_s20 }
  0x10   :  { %s256_s21 = scalar_lea.vmem %s29_s20, 512  ;;  %p261_p6 = scmp.lt.s32.totalorder %s29_s20, %s29_s20 }
  0x11   :  { %p257_p5 = scmp.ne.s32.totalorder %s29_s20, %s256_s21  ;;  %p262_p7 = scmp.lt.s32.totalorder %s256_s21, %s256_s21 }
  0x13   :  { %p263_p8 = por %p262_p7, %p261_p6 }
  0x15   :  { %p264_p9 = pnand %p263_p8, %p257_p5 }
  0x17   :  { %267 = shalt.err (!%p264_p9)
}
  0x18   :  { %s298_s22 = smov 64   ;;  %s299_s23 = smov 4  }
  0x19   :  { %34 = dma.hbm_to_vmem [thread:$0]  %s344_s1, 512, %s29_s20, [#allocation6], %s298_s22, %s298_s22, %s299_s23  }
  0x1a   :  { %288 = dma.done.wait [#allocation3], 512  }
  0x1b   :  { %289 = vsyncadd [#allocation3], 4294966784 }
  0x1c   :  { %290 = dma.done.wait [#allocation6], 512  }
  0x1d   :  { %291 = vsyncadd [#allocation6], 4294966784  ;;  %v224_v0 = vld [vmem:[#allocation5 + $0x18] sm:$0xff]   ;;  %v225_v1 = vld [vmem:[#allocation5 + $0x10] sm:$0xff]   ;;  %vm89_vm0 = vcmask 523264   ;;  %vm161_vm1 = vcmask 519168  }
  0x1e   :  { %205 = vmatprep.subr.bf16.mxu0 %v224_v0  ;;  %v226_v2 = vld [vmem:[#allocation5 + $0x8] sm:$0xff]   ;;  %v44_v3 = vld [vmem:[#allocation2] sm:$0xff]  ;;  %v46_v7 = vld [vmem:[#allocation2 + $0x10] sm:$0xff]  ;;  %s300_s26 = smov [#allocation7]  }
  0x1f   :  { %206 = vmatpush3.bf16.msra.mxu0 %v224_v0  ;;  %v45_v4 = vld [vmem:[#allocation2 + $0x8] sm:$0xff]  ;;  %v227_v6 = vld [vmem:[#allocation5] sm:$0xff]   ;;  %v47_v8 = vld [vmem:[#allocation2 + $0x18] sm:$0xff]  ;;  %s171_s27 = sshll.u32 %s300_s26, 4  ;;  %s172_s27 = int_to_ptr.vmem [resolvable:$true] %s171_s27 }
  0x20   :  { %207 = vmatprep.subr.bf16.mxu0 %v225_v1  ;;  %v48_v5 = vpack.c.bf16 %v45_v4, %v44_v3  ;;  %v49_v9 = vpack.c.bf16 %v47_v8, %v46_v7  ;;  %v184_v10 = vld [vmem:[%s345_s2] ss:$0 sm:$0xff]  ;;  %s268_s2 = scalar_lea.vmem %s172_s27, 256  ;;  %p273_p11 = scmp.lt.s32.totalorder %s172_s27, %s172_s27 }
  0x21   :  { %p269_p10 = scmp.ne.s32.totalorder %s172_s27, %s268_s2  ;;  %p274_p12 = scmp.lt.s32.totalorder %s268_s2, %s268_s2 }
  0x22   :  { %213 = vmatprep.mubr.msk.bf16.mxu0 %vm89_vm0, %v48_v5 }
  0x23   :  { %208 = vmatpush3.bf16.msra.mxu0 %v225_v1  ;;  %p275_p13 = por %p274_p12, %p273_p11 }
  0x24   :  { %209 = vmatprep.subr.bf16.mxu0 %v226_v2 }
  0x25   :  { %p276_p0 = pnand %p275_p13, %p269_p10 }
  0x27   :  { %210 = vmatpush3.bf16.msra.mxu0 %v226_v2 }
  0x28   :  { %211 = vmatprep.subr.bf16.mxu0 %v227_v6 }
  0x2b   :  { %212 = vmatpush3.bf16.msra.mxu0 %v227_v6 }
  0x2e   :  { %214 = vmatmul.mubr.msk.bf16.vlgmr.msra.gmra.mxu0 %vm89_vm0, %v49_v9 }
  0xee   :  { %v215_v11 = vpop.f32.mrf.mxu0 }
  0xef   :  { %v139_v12 = vadd.f32 %v215_v11, %v184_v10 }
  0xf0   :  { %v130_v13 = vpop.f32.mrf.mxu0 }
  0xf1   :  { %v197_v14 = vpack.c.bf16 %v139_v12, %v139_v12  ;;  %v131_v15 = vadd.f32 %v184_v10, %v130_v13 }
  0xf2   :  { %v216_v16 = vpop.f32.mrf.mxu0 }
  0xf3   :  { %164 = vst.msk [vmem:[#allocation7 + $0x8] sm:$0xf] %vm161_vm1, %v197_v14  ;;  %v195_v17 = vpack.c.bf16 %v131_v15, %v131_v15  ;;  %v142_v18 = vadd.f32 %v216_v16, %v184_v10 }
  0xf4   :  { %v133_v19 = vpop.f32.mrf.mxu0 }
  0xf5   :  { %162 = vst.msk [vmem:[#allocation7] sm:$0xf] %vm161_vm1, %v195_v17  ;;  %v198_v20 = vpack.c.bf16 %v142_v18, %v142_v18  ;;  %v134_v21 = vadd.f32 %v184_v10, %v133_v19 }
  0xf7   :  { %165 = vst.msk [vmem:[#allocation7 + $0xc] sm:$0xf] %vm161_vm1, %v198_v20  ;;  %v196_v22 = vpack.c.bf16 %v134_v21, %v134_v21 }
  0xf9   :  { %163 = vst.msk [vmem:[#allocation7 + $0x4] sm:$0xf] %vm161_vm1, %v196_v22 }
  0xfa   :  { %279 = shalt.err (!%p276_p0)
}
  0xfb   :  { %177 = dma.vmem_to_hbm [thread:$0]  %s172_s27, 256, %s346_s3, [#allocation4], %s298_s22, %s298_s22, %s299_s23  }
  0xfc   :  { %292 = dma.done.wait [#allocation4], 256  }
  0xfd   :  { %293 = vsyncadd [#allocation4], 4294967040 }
  0xfe   :  { %181 = vsyncpa [#allocation3], 1 }
  0xff   :  { %182 = vsyncpa [#allocation6], 1 }
 0x100   :  { %183 = vsyncpa [#allocation4], 1 }

</bundles_post_ra>
